<compile_context>
chip_gen: v6e
topology: v6e:2x2x1
jax: 0.10.0
libtpu: 0.0.40
codegen_flags: <defaults>
</compile_context>

<pallas_src>
import math
import functools

import jax
import jax.numpy as jnp
from jax.experimental import pallas as pl
from jax.experimental.pallas import tpu as pltpu


# ----------------------------------------------------------------------------- helpers
def _divisors(n: int):
    ds = set()
    i = 1
    while i * i <= n:
        if n % i == 0:
            ds.add(i)
            ds.add(n // i)
        i += 1
    return sorted(ds)


def _pick_row_tile(M: int, row_bytes: int, target_bytes: int = 8 << 20) -> int:
    """Largest row tile dividing M (preferring sublane multiples of 8 and at
    least 2 grid steps so v7x's two TensorCores both get work) whose per-tile
    footprint `tile * row_bytes` stays under `target_bytes`.  Degrades to the
    smallest divisor instead of the full extent when nothing fits."""
    divs = _divisors(M)
    cands = [t for t in divs if t % 8 == 0] or divs
    fitting = [t for t in cands if t * row_bytes <= target_bytes] or [min(cands)]
    multi = [t for t in fitting if M // t >= 2]
    return max(multi) if multi else max(fitting)


def _default_vmem_limit() -> int:
    """Scoped-VMEM limit: the 16/32 MiB defaults are too small once weights are
    resident at realistic D; stay well below v7x's 64 MiB physical VMEM."""
    limit = 48 << 20
    try:
        cap = int(pltpu.get_tpu_info().vmem_capacity_bytes)
        limit = max(32 << 20, min(100 << 20, cap - (16 << 20)))
    except Exception:
        pass
    return limit


# ----------------------------------------------------------------------------- kernels
def _qkv_kernel(x_ref, w_ref, b_ref, qkv_ref):
    # Fused Q/K/V projection: a single MXU matmul with a lane-dense (tM, 3D) output.
    qkv_ref[...] = (
        jnp.dot(x_ref[...], w_ref[...], preferred_element_type=jnp.float32)
        + b_ref[...]
    ).astype(qkv_ref.dtype)


def _attn_kernel(qkv_ref, o_ref, *, n_heads, d_model, d_k, scale):
    # qkv_ref: (S, 3*D) packed [Q | K | V] for one batch; o_ref: (S, D).
    # Heads are static column slices of the packed buffer, so no HBM-level head
    # split/merge transposes are needed anywhere.
    # TODO(synk): for long sequences this should become a flash-style
    #             online-softmax kernel tiled over the key axis (the (S, S)
    #             score tile below is materialized in VMEM).
    # TODO(synk): attention mask (masked_fill with -1e9) not implemented
    #             (mask=None path only).
    for h in range(n_heads):
        lo = h * d_k
        q = qkv_ref[:, lo:lo + d_k].astype(jnp.float32) * scale   # fold 1/sqrt(dk) into q
        k = qkv_ref[:, d_model + lo:d_model + lo + d_k]
        v = qkv_ref[:, 2 * d_model + lo:2 * d_model + lo + d_k]
        s = jax.lax.dot_general(q, k, (((1,), (1,)), ((), ())),
                                preferred_element_type=jnp.float32)
        m = jnp.max(s, axis=-1, keepdims=True)
        p = jnp.exp(s - m)
        denom = jnp.sum(p, axis=-1, keepdims=True)
        # Deferred normalization: divide the (S, d_k) result, not the (S, S) scores.
        o = jnp.dot(p, v.astype(jnp.float32),
                    preferred_element_type=jnp.float32) / denom
        o_ref[:, lo:lo + d_k] = o.astype(o_ref.dtype)


def _out_proj_res_ln_kernel(a_ref, x_ref, w_ref, b_ref, g_ref, beta_ref, o_ref):
    # fc projection + residual + LayerNorm, fused (dropout = identity).
    y = jnp.dot(a_ref[...], w_ref[...], preferred_element_type=jnp.float32) + b_ref[...]
    h = x_ref[...].astype(jnp.float32) + y
    mu = jnp.mean(h, axis=-1, keepdims=True)
    var = jnp.mean(jnp.square(h - mu), axis=-1, keepdims=True)
    hn = (h - mu) * jax.lax.rsqrt(var + 1e-5)
    o_ref[...] = (hn * g_ref[...] + beta_ref[...]).astype(o_ref.dtype)


def _ffn_res_ln_kernel(x_ref, w1_ref, b1_ref, w2_ref, b2_ref, g_ref, beta_ref,
                       o_ref, acc_ref):
    # Linear1 + LeakyReLU + Linear2, tiled over the FF hidden dim (grid axis 1,
    # "arbitrary") with an f32 VMEM accumulator; residual + LayerNorm epilogue on
    # the last hidden-dim step.  Valid because LeakyReLU and b1 are column-wise in
    # the hidden dim.  (Dropout = identity.)
    j = pl.program_id(1)

    @pl.when(j == 0)
    def _():
        acc_ref[...] = jnp.zeros_like(acc_ref)

    x = x_ref[...]
    h1 = jnp.dot(x, w1_ref[...], preferred_element_type=jnp.float32) + b1_ref[...]
    h1 = jnp.where(h1 >= 0, h1, 0.01 * h1)                        # LeakyReLU(0.01)
    acc_ref[...] += jnp.dot(h1, w2_ref[...], preferred_element_type=jnp.float32)

    @pl.when(j == pl.num_programs(1) - 1)
    def _():
        h = x.astype(jnp.float32) + acc_ref[...] + b2_ref[...]
        mu = jnp.mean(h, axis=-1, keepdims=True)
        var = jnp.mean(jnp.square(h - mu), axis=-1, keepdims=True)
        hn = (h - mu) * jax.lax.rsqrt(var + 1e-5)
        o_ref[...] = (hn * g_ref[...] + beta_ref[...]).astype(o_ref.dtype)


# ----------------------------------------------------------------------------- wrapper
def transformer_block_forward(x, params, *, n_heads, mask=None):
    """x: (B, S, D) float32.  Returns (B, S, D).  mask must be None (TODO)."""
    assert mask is None, "mask support not implemented (mask=None path only)"
    B, S, D = x.shape
    assert D % n_heads == 0
    dk = D // n_heads
    M = B * S
    F = params["w1"].shape[1]

    # Row tile shared by the row-parallel kernels; budget by the widest per-row
    # footprint (QKV: D in + 3D out; FFN: D in + tF hidden + 2D acc/out), x2 for
    # double-buffering.
    tF = max([t for t in _divisors(F) if t % 128 == 0 and t <= 512], default=F)
    row_bytes = 4 * 2 * max(4 * D, 3 * D + tF)
    tM = _pick_row_tile(M, row_bytes)
    grid_rows = M // tM
    grid_f = F // tF

    cparams = functools.partial(
        pltpu.CompilerParams, vmem_limit_bytes=_default_vmem_limit())

    x2d = x.reshape(M, D)
    row_spec = pl.BlockSpec((tM, D), lambda i: (i, 0))
    # TODO(synk): grid-invariant weight specs below would ideally be single-
    #             buffered (pipeline_mode=pl.Buffered(1)) to halve weight VMEM.

    # Fused QKV weight/bias (in deployment these would be pre-concatenated once).
    wqkv = jnp.concatenate([params["wq"], params["wk"], params["wv"]], axis=1)
    bqkv = jnp.concatenate([params["bq"], params["bk"], params["bv"]], axis=1)

    # ---- 1. fused Q/K/V projection -> packed (M, 3D) --------------------------------
    qkv2d = pl.pallas_call(
        _qkv_kernel,
        out_shape=jax.ShapeDtypeStruct((M, 3 * D), x.dtype),
        grid_spec=pltpu.PrefetchScalarGridSpec(
            num_scalar_prefetch=0,
            grid=(grid_rows,),
            in_specs=[
                row_spec,
                pl.BlockSpec((D, 3 * D), lambda i: (0, 0)),
                pl.BlockSpec((1, 3 * D), lambda i: (0, 0)),
            ],
            out_specs=pl.BlockSpec((tM, 3 * D), lambda i: (i, 0)),
        ),
        compiler_params=cparams(dimension_semantics=("parallel",)),
    )(x2d, wqkv, bqkv)

    # ---- 2. attention: all heads of one batch per grid step (no transposes) ---------
    attn2d = pl.pallas_call(
        functools.partial(_attn_kernel, n_heads=n_heads, d_model=D, d_k=dk,
                          scale=1.0 / math.sqrt(dk)),
        out_shape=jax.ShapeDtypeStruct((M, D), x.dtype),
        grid_spec=pltpu.PrefetchScalarGridSpec(
            num_scalar_prefetch=0,
            grid=(B,),
            in_specs=[pl.BlockSpec((S, 3 * D), lambda b: (b, 0))],
            out_specs=pl.BlockSpec((S, D), lambda b: (b, 0)),
        ),
        compiler_params=cparams(dimension_semantics=("parallel",)),
    )(qkv2d)

    # ---- 3. output projection + residual + LayerNorm (fused) ------------------------
    h2d = pl.pallas_call(
        _out_proj_res_ln_kernel,
        out_shape=jax.ShapeDtypeStruct((M, D), x.dtype),
        grid_spec=pltpu.PrefetchScalarGridSpec(
            num_scalar_prefetch=0,
            grid=(grid_rows,),
            in_specs=[
                row_spec, row_spec,
                pl.BlockSpec((D, D), lambda i: (0, 0)),
                pl.BlockSpec((1, D), lambda i: (0, 0)),
                pl.BlockSpec((1, D), lambda i: (0, 0)),
                pl.BlockSpec((1, D), lambda i: (0, 0)),
            ],
            out_specs=row_spec,
        ),
        compiler_params=cparams(dimension_semantics=("parallel",)),
    )(attn2d, x2d, params["wfc"], params["bfc"], params["g1"], params["be1"])

    # ---- 4. feed-forward (hidden-dim tiled) + residual + LayerNorm (fused) ----------
    ffn_row_spec = pl.BlockSpec((tM, D), lambda i, j: (i, 0))
    y2d = pl.pallas_call(
        _ffn_res_ln_kernel,
        out_shape=jax.ShapeDtypeStruct((M, D), x.dtype),
        grid_spec=pltpu.PrefetchScalarGridSpec(
            num_scalar_prefetch=0,
            grid=(grid_rows, grid_f),
            in_specs=[
                ffn_row_spec,
                pl.BlockSpec((D, tF), lambda i, j: (0, j)),
                pl.BlockSpec((1, tF), lambda i, j: (0, j)),
                pl.BlockSpec((tF, D), lambda i, j: (j, 0)),
                pl.BlockSpec((1, D), lambda i, j: (0, 0)),
                pl.BlockSpec((1, D), lambda i, j: (0, 0)),
                pl.BlockSpec((1, D), lambda i, j: (0, 0)),
            ],
            out_specs=ffn_row_spec,
            scratch_shapes=[pltpu.VMEM((tM, D), jnp.float32)],
        ),
        compiler_params=cparams(dimension_semantics=("parallel", "arbitrary")),
    )(h2d, params["w1"], params["b1"], params["w2"], params["b2"],
      params["g2"], params["be2"])

    return y2d.reshape(B, S, D)


# ----------------------------------------------------------------------------- reference
def transformer_block_ref(x, params, n_heads):
    B, S, D = x.shape
    dk = D // n_heads
    hp = jax.lax.Precision.HIGHEST

    def ln(h, g, b, eps=1e-5):
        mu = jnp.mean(h, axis=-1, keepdims=True)
        var = jnp.mean(jnp.square(h - mu), axis=-1, keepdims=True)
        return (h - mu) * jax.lax.rsqrt(var + eps) * g + b

    q = jnp.einsum("bsd,de->bse", x, params["wq"], precision=hp) + params["bq"]
    k = jnp.einsum("bsd,de->bse", x, params["wk"], precision=hp) + params["bk"]
    v = jnp.einsum("bsd,de->bse", x, params["wv"], precision=hp) + params["bv"]

    def split(t):
        return t.reshape(B, S, n_heads, dk).transpose(0, 2, 1, 3)

    qh, kh, vh = split(q), split(k), split(v)
    scores = jnp.einsum("bhqd,bhkd->bhqk", qh, kh, precision=hp) / math.sqrt(dk)
    attn = jax.nn.softmax(scores, axis=-1)
    out = jnp.einsum("bhqk,bhkd->bhqd", attn, vh, precision=hp)
    out = out.transpose(0, 2, 1, 3).reshape(B, S, D)
    out = jnp.einsum("bsd,de->bse", out, params["wfc"], precision=hp) + params["bfc"]

    h = ln(x + out, params["g1"], params["be1"])
    ff = jnp.einsum("bsd,df->bsf", h, params["w1"], precision=hp) + params["b1"]
    ff = jnp.where(ff >= 0, ff, 0.01 * ff)
    ff = jnp.einsum("bsf,fd->bsd", ff, params["w2"], precision=hp) + params["b2"]
    return ln(h + ff, params["g2"], params["be2"])


# ----------------------------------------------------------------------------- main
if __name__ == "__main__":
    B, S, D, H, FF = 2, 8, 32, 4, 64

    key = jax.random.PRNGKey(0)
    ks = jax.random.split(key, 16)

    def w(k, shape, fan_in):
        return jax.random.normal(k, shape, jnp.float32) / math.sqrt(fan_in)

    def b(k, shape):
        return 0.1 * jax.random.normal(k, shape, jnp.float32)

    params = {
        "wq": w(ks[0], (D, D), D), "bq": b(ks[1], (1, D)),
        "wk": w(ks[2], (D, D), D), "bk": b(ks[3], (1, D)),
        "wv": w(ks[4], (D, D), D), "bv": b(ks[5], (1, D)),
        "wfc": w(ks[6], (D, D), D), "bfc": b(ks[7], (1, D)),
        "w1": w(ks[8], (D, FF), D), "b1": b(ks[9], (1, FF)),
        "w2": w(ks[10], (FF, D), FF), "b2": b(ks[11], (1, D)),
        "g1": jnp.ones((1, D), jnp.float32), "be1": jnp.zeros((1, D), jnp.float32),
        "g2": jnp.ones((1, D), jnp.float32), "be2": jnp.zeros((1, D), jnp.float32),
    }

    x = jax.random.normal(ks[12], (B, S, D), dtype=jnp.float32)

    fwd = jax.jit(functools.partial(transformer_block_forward, n_heads=H))
    out = jax.block_until_ready(fwd(x, params))

    ref = transformer_block_ref(x, params, H)

    assert out.shape == (B, S, D)
    max_err = float(jnp.max(jnp.abs(out - ref)))
    assert jnp.allclose(out, ref, atol=2e-3, rtol=2e-3), f"mismatch vs reference, max_err={max_err}"

    print("KERNEL_OK")
</pallas_src>

<mosaic_0001>
module attributes {stable_mosaic.version = 11 : i64} {
  func.func @_qkv_kernel(%arg0: i32, %arg1: memref<8x32xf32, #tpu.memory_space<vmem>>, %arg2: memref<32x96xf32, #tpu.memory_space<vmem>>, %arg3: memref<1x96xf32, #tpu.memory_space<vmem>>, %arg4: memref<8x96xf32, #tpu.memory_space<vmem>>) attributes {dimension_semantics = [#tpu.dimension_semantics<parallel>], iteration_bounds = array<i64: 2>, scalar_prefetch = 0 : i64, scratch_operands = 0 : i64, tpu.core_type = #tpu.core_type<tc>, window_params = [{transform_indices = @transform_0, window_bounds = array<i64: 8, 32>}, {pipeline_mode = #tpu.pipeline_mode<synchronous>, transform_indices = @transform_1, window_bounds = array<i64: 32, 96>}, {pipeline_mode = #tpu.pipeline_mode<synchronous>, transform_indices = @transform_2, window_bounds = array<i64: 1, 96>}, {transform_indices = @transform_3, window_bounds = array<i64: 8, 96>}]} {
    %c0 = arith.constant 0 : index
    %c0_0 = arith.constant 0 : index
    %0 = vector.load %arg1[%c0, %c0_0] : memref<8x32xf32, #tpu.memory_space<vmem>>, vector<8x32xf32>
    %c0_1 = arith.constant 0 : index
    %c0_2 = arith.constant 0 : index
    %1 = vector.load %arg2[%c0_1, %c0_2] : memref<32x96xf32, #tpu.memory_space<vmem>>, vector<32x96xf32>
    %cst = arith.constant dense<0.000000e+00> : vector<8x96xf32>
    %2 = tpu.matmul %0, %1, %cst {dimension_numbers = #tpu.dot_dimension_numbers<[1], [0], [0], [1], [0, 0, 1, 1], [], []>} : vector<8x32xf32>, vector<32x96xf32>, vector<8x96xf32> -> vector<8x96xf32>
    %c0_3 = arith.constant 0 : index
    %c0_4 = arith.constant 0 : index
    %3 = vector.load %arg3[%c0_3, %c0_4] : memref<1x96xf32, #tpu.memory_space<vmem>>, vector<1x96xf32>
    %4 = vector.broadcast %3 : vector<1x96xf32> to vector<8x96xf32>
    %5 = arith.addf %2, %4 : vector<8x96xf32>
    %c0_5 = arith.constant 0 : index
    %c0_6 = arith.constant 0 : index
    %6 = vector.load %arg4[%c0_5, %c0_6] : memref<8x96xf32, #tpu.memory_space<vmem>>, vector<8x96xf32>
    tpu.vector_store %arg4[%c0_5, %c0_6], %5 {strides = array<i32>} : memref<8x96xf32, #tpu.memory_space<vmem>>, vector<8x96xf32>,
    return
  }
  func.func @transform_0(%arg0: i32) -> (i32, i32) {
    %c0_i32 = arith.constant 0 : i32
    %c0_i32_0 = arith.constant 0 : i32
    return %arg0, %c0_i32 : i32, i32
  }
  func.func @transform_1(%arg0: i32) -> (i32, i32) {
    %c0_i32 = arith.constant 0 : i32
    %c0_i32_0 = arith.constant 0 : i32
    %c0_i32_1 = arith.constant 0 : i32
    return %c0_i32, %c0_i32_0 : i32, i32
  }
  func.func @transform_2(%arg0: i32) -> (i32, i32) {
    %c0_i32 = arith.constant 0 : i32
    %c0_i32_0 = arith.constant 0 : i32
    %c0_i32_1 = arith.constant 0 : i32
    return %c0_i32, %c0_i32_0 : i32, i32
  }
  func.func @transform_3(%arg0: i32) -> (i32, i32) {
    %c0_i32 = arith.constant 0 : i32
    %c0_i32_0 = arith.constant 0 : i32
    return %arg0, %c0_i32 : i32, i32
  }
}

module attributes {stable_mosaic.version = 11 : i64} {
  func.func @_attn_kernel(%arg0: i32, %arg1: memref<8x96xf32, #tpu.memory_space<vmem>>, %arg2: memref<8x32xf32, #tpu.memory_space<vmem>>) attributes {dimension_semantics = [#tpu.dimension_semantics<parallel>], iteration_bounds = array<i64: 2>, scalar_prefetch = 0 : i64, scratch_operands = 0 : i64, tpu.core_type = #tpu.core_type<tc>, window_params = [{transform_indices = @transform_0, window_bounds = array<i64: 8, 96>}, {transform_indices = @transform_1, window_bounds = array<i64: 8, 32>}]} {
    %c0 = arith.constant 0 : index
    %c0_0 = arith.constant 0 : index
    %0 = vector.load %arg1[%c0, %c0_0] : memref<8x96xf32, #tpu.memory_space<vmem>>, vector<8x8xf32>
    %cst = arith.constant 0.353553385 : f32
    %1 = vector.broadcast %cst : f32 to vector<8x8xf32>
    %2 = arith.mulf %0, %1 : vector<8x8xf32>
    %c0_1 = arith.constant 0 : index
    %c32 = arith.constant 32 : index
    %3 = vector.load %arg1[%c0_1, %c32] : memref<8x96xf32, #tpu.memory_space<vmem>>, vector<8x8xf32>
    %c0_2 = arith.constant 0 : index
    %c64 = arith.constant 64 : index
    %4 = vector.load %arg1[%c0_2, %c64] : memref<8x96xf32, #tpu.memory_space<vmem>>, vector<8x8xf32>
    %cst_3 = arith.constant dense<0.000000e+00> : vector<8x8xf32>
    %5 = tpu.matmul %2, %3, %cst_3 {dimension_numbers = #tpu.dot_dimension_numbers<[1], [1], [0], [0], [0, 0, 1, 0], [], []>} : vector<8x8xf32>, vector<8x8xf32>, vector<8x8xf32> -> vector<8x8xf32>
    %cst_4 = arith.constant dense<0xFF800000> : vector<8xf32>
    %6 = vector.multi_reduction <maximumf>, %5, %cst_4 [1] : vector<8x8xf32> to vector<8xf32>
    %7 = vector.shape_cast %6 : vector<8xf32> to vector<8x1xf32>
    %8 = vector.broadcast %7 : vector<8x1xf32> to vector<8x8xf32>
    %9 = arith.subf %5, %8 : vector<8x8xf32>
    %10 = math.exp %9 : vector<8x8xf32>
    %cst_5 = arith.constant dense<0.000000e+00> : vector<8xf32>
    %11 = vector.multi_reduction <add>, %10, %cst_5 [1] : vector<8x8xf32> to vector<8xf32>
    %12 = vector.shape_cast %11 : vector<8xf32> to vector<8x1xf32>
    %cst_6 = arith.constant dense<0.000000e+00> : vector<8x8xf32>
    %13 = tpu.matmul %10, %4, %cst_6 {dimension_numbers = #tpu.dot_dimension_numbers<[1], [0], [0], [1], [0, 0, 1, 1], [], []>} : vector<8x8xf32>, vector<8x8xf32>, vector<8x8xf32> -> vector<8x8xf32>
    %14 = vector.broadcast %12 : vector<8x1xf32> to vector<8x8xf32>
    %15 = arith.divf %13, %14 : vector<8x8xf32>
    %c0_7 = arith.constant 0 : index
    %c0_8 = arith.constant 0 : index
    %16 = vector.load %arg2[%c0_7, %c0_8] : memref<8x32xf32, #tpu.memory_space<vmem>>, vector<8x8xf32>
    tpu.vector_store %arg2[%c0_7, %c0_8], %15 {strides = array<i32>} : memref<8x32xf32, #tpu.memory_space<vmem>>, vector<8x8xf32>,
    %c0_9 = arith.constant 0 : index
    %c8 = arith.constant 8 : index
    %17 = vector.load %arg1[%c0_9, %c8] : memref<8x96xf32, #tpu.memory_space<vmem>>, vector<8x8xf32>
    %cst_10 = arith.constant 0.353553385 : f32
    %18 = vector.broadcast %cst_10 : f32 to vector<8x8xf32>
    %19 = arith.mulf %17, %18 : vector<8x8xf32>
    %c0_11 = arith.constant 0 : index
    %c40 = arith.constant 40 : index
    %20 = vector.load %arg1[%c0_11, %c40] : memref<8x96xf32, #tpu.memory_space<vmem>>, vector<8x8xf32>
    %c0_12 = arith.constant 0 : index
    %c72 = arith.constant 72 : index
    %21 = vector.load %arg1[%c0_12, %c72] : memref<8x96xf32, #tpu.memory_space<vmem>>, vector<8x8xf32>
    %cst_13 = arith.constant dense<0.000000e+00> : vector<8x8xf32>
    %22 = tpu.matmul %19, %20, %cst_13 {dimension_numbers = #tpu.dot_dimension_numbers<[1], [1], [0], [0], [0, 0, 1, 0], [], []>} : vector<8x8xf32>, vector<8x8xf32>, vector<8x8xf32> -> vector<8x8xf32>
    %cst_14 = arith.constant dense<0xFF800000> : vector<8xf32>
    %23 = vector.multi_reduction <maximumf>, %22, %cst_14 [1] : vector<8x8xf32> to vector<8xf32>
    %24 = vector.shape_cast %23 : vector<8xf32> to vector<8x1xf32>
    %25 = vector.broadcast %24 : vector<8x1xf32> to vector<8x8xf32>
    %26 = arith.subf %22, %25 : vector<8x8xf32>
    %27 = math.exp %26 : vector<8x8xf32>
    %cst_15 = arith.constant dense<0.000000e+00> : vector<8xf32>
    %28 = vector.multi_reduction <add>, %27, %cst_15 [1] : vector<8x8xf32> to vector<8xf32>
    %29 = vector.shape_cast %28 : vector<8xf32> to vector<8x1xf32>
    %cst_16 = arith.constant dense<0.000000e+00> : vector<8x8xf32>
    %30 = tpu.matmul %27, %21, %cst_16 {dimension_numbers = #tpu.dot_dimension_numbers<[1], [0], [0], [1], [0, 0, 1, 1], [], []>} : vector<8x8xf32>, vector<8x8xf32>, vector<8x8xf32> -> vector<8x8xf32>
    %31 = vector.broadcast %29 : vector<8x1xf32> to vector<8x8xf32>
    %32 = arith.divf %30, %31 : vector<8x8xf32>
    %c0_17 = arith.constant 0 : index
    %c8_18 = arith.constant 8 : index
    %33 = vector.load %arg2[%c0_17, %c8_18] : memref<8x32xf32, #tpu.memory_space<vmem>>, vector<8x8xf32>
    tpu.vector_store %arg2[%c0_17, %c8_18], %32 {strides = array<i32>} : memref<8x32xf32, #tpu.memory_space<vmem>>, vector<8x8xf32>,
    %c0_19 = arith.constant 0 : index
    %c16 = arith.constant 16 : index
    %34 = vector.load %arg1[%c0_19, %c16] : memref<8x96xf32, #tpu.memory_space<vmem>>, vector<8x8xf32>
    %cst_20 = arith.constant 0.353553385 : f32
    %35 = vector.broadcast %cst_20 : f32 to vector<8x8xf32>
    %36 = arith.mulf %34, %35 : vector<8x8xf32>
    %c0_21 = arith.constant 0 : index
    %c48 = arith.constant 48 : index
    %37 = vector.load %arg1[%c0_21, %c48] : memref<8x96xf32, #tpu.memory_space<vmem>>, vector<8x8xf32>
    %c0_22 = arith.constant 0 : index
    %c80 = arith.constant 80 : index
    %38 = vector.load %arg1[%c0_22, %c80] : memref<8x96xf32, #tpu.memory_space<vmem>>, vector<8x8xf32>
    %cst_23 = arith.constant dense<0.000000e+00> : vector<8x8xf32>
    %39 = tpu.matmul %36, %37, %cst_23 {dimension_numbers = #tpu.dot_dimension_numbers<[1], [1], [0], [0], [0, 0, 1, 0], [], []>} : vector<8x8xf32>, vector<8x8xf32>, vector<8x8xf32> -> vector<8x8xf32>
    %cst_24 = arith.constant dense<0xFF800000> : vector<8xf32>
    %40 = vector.multi_reduction <maximumf>, %39, %cst_24 [1] : vector<8x8xf32> to vector<8xf32>
    %41 = vector.shape_cast %40 : vector<8xf32> to vector<8x1xf32>
    %42 = vector.broadcast %41 : vector<8x1xf32> to vector<8x8xf32>
    %43 = arith.subf %39, %42 : vector<8x8xf32>
    %44 = math.exp %43 : vector<8x8xf32>
    %cst_25 = arith.constant dense<0.000000e+00> : vector<8xf32>
    %45 = vector.multi_reduction <add>, %44, %cst_25 [1] : vector<8x8xf32> to vector<8xf32>
    %46 = vector.shape_cast %45 : vector<8xf32> to vector<8x1xf32>
    %cst_26 = arith.constant dense<0.000000e+00> : vector<8x8xf32>
    %47 = tpu.matmul %44, %38, %cst_26 {dimension_numbers = #tpu.dot_dimension_numbers<[1], [0], [0], [1], [0, 0, 1, 1], [], []>} : vector<8x8xf32>, vector<8x8xf32>, vector<8x8xf32> -> vector<8x8xf32>
    %48 = vector.broadcast %46 : vector<8x1xf32> to vector<8x8xf32>
    %49 = arith.divf %47, %48 : vector<8x8xf32>
    %c0_27 = arith.constant 0 : index
    %c16_28 = arith.constant 16 : index
    %50 = vector.load %arg2[%c0_27, %c16_28] : memref<8x32xf32, #tpu.memory_space<vmem>>, vector<8x8xf32>
    tpu.vector_store %arg2[%c0_27, %c16_28], %49 {strides = array<i32>} : memref<8x32xf32, #tpu.memory_space<vmem>>, vector<8x8xf32>,
    %c0_29 = arith.constant 0 : index
    %c24 = arith.constant 24 : index
    %51 = vector.load %arg1[%c0_29, %c24] : memref<8x96xf32, #tpu.memory_space<vmem>>, vector<8x8xf32>
    %cst_30 = arith.constant 0.353553385 : f32
    %52 = vector.broadcast %cst_30 : f32 to vector<8x8xf32>
    %53 = arith.mulf %51, %52 : vector<8x8xf32>
    %c0_31 = arith.constant 0 : index
    %c56 = arith.constant 56 : index
    %54 = vector.load %arg1[%c0_31, %c56] : memref<8x96xf32, #tpu.memory_space<vmem>>, vector<8x8xf32>
    %c0_32 = arith.constant 0 : index
    %c88 = arith.constant 88 : index
    %55 = vector.load %arg1[%c0_32, %c88] : memref<8x96xf32, #tpu.memory_space<vmem>>, vector<8x8xf32>
    %cst_33 = arith.constant dense<0.000000e+00> : vector<8x8xf32>
    %56 = tpu.matmul %53, %54, %cst_33 {dimension_numbers = #tpu.dot_dimension_numbers<[1], [1], [0], [0], [0, 0, 1, 0], [], []>} : vector<8x8xf32>, vector<8x8xf32>, vector<8x8xf32> -> vector<8x8xf32>
    %cst_34 = arith.constant dense<0xFF800000> : vector<8xf32>
    %57 = vector.multi_reduction <maximumf>, %56, %cst_34 [1] : vector<8x8xf32> to vector<8xf32>
    %58 = vector.shape_cast %57 : vector<8xf32> to vector<8x1xf32>
    %59 = vector.broadcast %58 : vector<8x1xf32> to vector<8x8xf32>
    %60 = arith.subf %56, %59 : vector<8x8xf32>
    %61 = math.exp %60 : vector<8x8xf32>
    %cst_35 = arith.constant dense<0.000000e+00> : vector<8xf32>
    %62 = vector.multi_reduction <add>, %61, %cst_35 [1] : vector<8x8xf32> to vector<8xf32>
    %63 = vector.shape_cast %62 : vector<8xf32> to vector<8x1xf32>
    %cst_36 = arith.constant dense<0.000000e+00> : vector<8x8xf32>
    %64 = tpu.matmul %61, %55, %cst_36 {dimension_numbers = #tpu.dot_dimension_numbers<[1], [0], [0], [1], [0, 0, 1, 1], [], []>} : vector<8x8xf32>, vector<8x8xf32>, vector<8x8xf32> -> vector<8x8xf32>
    %65 = vector.broadcast %63 : vector<8x1xf32> to vector<8x8xf32>
    %66 = arith.divf %64, %65 : vector<8x8xf32>
    %c0_37 = arith.constant 0 : index
    %c24_38 = arith.constant 24 : index
    %67 = vector.load %arg2[%c0_37, %c24_38] : memref<8x32xf32, #tpu.memory_space<vmem>>, vector<8x8xf32>
    tpu.vector_store %arg2[%c0_37, %c24_38], %66 {strides = array<i32>} : memref<8x32xf32, #tpu.memory_space<vmem>>, vector<8x8xf32>,
    return
  }
  func.func @transform_0(%arg0: i32) -> (i32, i32) {
    %c0_i32 = arith.constant 0 : i32
    %c0_i32_0 = arith.constant 0 : i32
    return %arg0, %c0_i32 : i32, i32
  }
  func.func @transform_1(%arg0: i32) -> (i32, i32) {
    %c0_i32 = arith.constant 0 : i32
    %c0_i32_0 = arith.constant 0 : i32
    return %arg0, %c0_i32 : i32, i32
  }
}

module attributes {stable_mosaic.version = 11 : i64} {
  func.func @_out_proj_res_ln_kernel(%arg0: i32, %arg1: memref<8x32xf32, #tpu.memory_space<vmem>>, %arg2: memref<8x32xf32, #tpu.memory_space<vmem>>, %arg3: memref<32x32xf32, #tpu.memory_space<vmem>>, %arg4: memref<1x32xf32, #tpu.memory_space<vmem>>, %arg5: memref<1x32xf32, #tpu.memory_space<vmem>>, %arg6: memref<1x32xf32, #tpu.memory_space<vmem>>, %arg7: memref<8x32xf32, #tpu.memory_space<vmem>>) attributes {dimension_semantics = [#tpu.dimension_semantics<parallel>], iteration_bounds = array<i64: 2>, scalar_prefetch = 0 : i64, scratch_operands = 0 : i64, tpu.core_type = #tpu.core_type<tc>, window_params = [{transform_indices = @transform_0, window_bounds = array<i64: 8, 32>}, {transform_indices = @transform_1, window_bounds = array<i64: 8, 32>}, {pipeline_mode = #tpu.pipeline_mode<synchronous>, transform_indices = @transform_2, window_bounds = array<i64: 32, 32>}, {pipeline_mode = #tpu.pipeline_mode<synchronous>, transform_indices = @transform_3, window_bounds = array<i64: 1, 32>}, {pipeline_mode = #tpu.pipeline_mode<synchronous>, transform_indices = @transform_4, window_bounds = array<i64: 1, 32>}, {pipeline_mode = #tpu.pipeline_mode<synchronous>, transform_indices = @transform_5, window_bounds = array<i64: 1, 32>}, {transform_indices = @transform_6, window_bounds = array<i64: 8, 32>}]} {
    %c0 = arith.constant 0 : index
    %c0_0 = arith.constant 0 : index
    %0 = vector.load %arg1[%c0, %c0_0] : memref<8x32xf32, #tpu.memory_space<vmem>>, vector<8x32xf32>
    %c0_1 = arith.constant 0 : index
    %c0_2 = arith.constant 0 : index
    %1 = vector.load %arg3[%c0_1, %c0_2] : memref<32x32xf32, #tpu.memory_space<vmem>>, vector<32x32xf32>
    %cst = arith.constant dense<0.000000e+00> : vector<8x32xf32>
    %2 = tpu.matmul %0, %1, %cst {dimension_numbers = #tpu.dot_dimension_numbers<[1], [0], [0], [1], [0, 0, 1, 1], [], []>} : vector<8x32xf32>, vector<32x32xf32>, vector<8x32xf32> -> vector<8x32xf32>
    %c0_3 = arith.constant 0 : index
    %c0_4 = arith.constant 0 : index
    %3 = vector.load %arg4[%c0_3, %c0_4] : memref<1x32xf32, #tpu.memory_space<vmem>>, vector<1x32xf32>
    %4 = vector.broadcast %3 : vector<1x32xf32> to vector<8x32xf32>
    %5 = arith.addf %2, %4 : vector<8x32xf32>
    %c0_5 = arith.constant 0 : index
    %c0_6 = arith.constant 0 : index
    %6 = vector.load %arg2[%c0_5, %c0_6] : memref<8x32xf32, #tpu.memory_space<vmem>>, vector<8x32xf32>
    %7 = arith.addf %6, %5 : vector<8x32xf32>
    %cst_7 = arith.constant dense<0.000000e+00> : vector<8xf32>
    %8 = vector.multi_reduction <add>, %7, %cst_7 [1] : vector<8x32xf32> to vector<8xf32>
    %9 = vector.shape_cast %8 : vector<8xf32> to vector<8x1xf32>
    %cst_8 = arith.constant 3.200000e+01 : f32
    %10 = vector.broadcast %cst_8 : f32 to vector<8x1xf32>
    %11 = arith.divf %9, %10 : vector<8x1xf32>
    %12 = vector.broadcast %11 : vector<8x1xf32> to vector<8x32xf32>
    %13 = arith.subf %7, %12 : vector<8x32xf32>
    %14 = arith.mulf %13, %13 : vector<8x32xf32>
    %cst_9 = arith.constant dense<0.000000e+00> : vector<8xf32>
    %15 = vector.multi_reduction <add>, %14, %cst_9 [1] : vector<8x32xf32> to vector<8xf32>
    %16 = vector.shape_cast %15 : vector<8xf32> to vector<8x1xf32>
    %cst_10 = arith.constant 3.200000e+01 : f32
    %17 = vector.broadcast %cst_10 : f32 to vector<8x1xf32>
    %18 = arith.divf %16, %17 : vector<8x1xf32>
    %19 = vector.broadcast %11 : vector<8x1xf32> to vector<8x32xf32>
    %20 = arith.subf %7, %19 : vector<8x32xf32>
    %cst_11 = arith.constant 9.99999974E-6 : f32
    %21 = vector.broadcast %cst_11 : f32 to vector<8x1xf32>
    %22 = arith.addf %18, %21 : vector<8x1xf32>
    %23 = math.rsqrt %22 : vector<8x1xf32>
    %24 = vector.broadcast %23 : vector<8x1xf32> to vector<8x32xf32>
    %25 = arith.mulf %20, %24 : vector<8x32xf32>
    %c0_12 = arith.constant 0 : index
    %c0_13 = arith.constant 0 : index
    %26 = vector.load %arg5[%c0_12, %c0_13] : memref<1x32xf32, #tpu.memory_space<vmem>>, vector<1x32xf32>
    %27 = vector.broadcast %26 : vector<1x32xf32> to vector<8x32xf32>
    %28 = arith.mulf %25, %27 : vector<8x32xf32>
    %c0_14 = arith.constant 0 : index
    %c0_15 = arith.constant 0 : index
    %29 = vector.load %arg6[%c0_14, %c0_15] : memref<1x32xf32, #tpu.memory_space<vmem>>, vector<1x32xf32>
    %30 = vector.broadcast %29 : vector<1x32xf32> to vector<8x32xf32>
    %31 = arith.addf %28, %30 : vector<8x32xf32>
    %c0_16 = arith.constant 0 : index
    %c0_17 = arith.constant 0 : index
    %32 = vector.load %arg7[%c0_16, %c0_17] : memref<8x32xf32, #tpu.memory_space<vmem>>, vector<8x32xf32>
    tpu.vector_store %arg7[%c0_16, %c0_17], %31 {strides = array<i32>} : memref<8x32xf32, #tpu.memory_space<vmem>>, vector<8x32xf32>,
    return
  }
  func.func @transform_0(%arg0: i32) -> (i32, i32) {
    %c0_i32 = arith.constant 0 : i32
    %c0_i32_0 = arith.constant 0 : i32
    return %arg0, %c0_i32 : i32, i32
  }
  func.func @transform_1(%arg0: i32) -> (i32, i32) {
    %c0_i32 = arith.constant 0 : i32
    %c0_i32_0 = arith.constant 0 : i32
    return %arg0, %c0_i32 : i32, i32
  }
  func.func @transform_2(%arg0: i32) -> (i32, i32) {
    %c0_i32 = arith.constant 0 : i32
    %c0_i32_0 = arith.constant 0 : i32
    %c0_i32_1 = arith.constant 0 : i32
    return %c0_i32, %c0_i32_0 : i32, i32
  }
  func.func @transform_3(%arg0: i32) -> (i32, i32) {
    %c0_i32 = arith.constant 0 : i32
    %c0_i32_0 = arith.constant 0 : i32
    %c0_i32_1 = arith.constant 0 : i32
    return %c0_i32, %c0_i32_0 : i32, i32
  }
  func.func @transform_4(%arg0: i32) -> (i32, i32) {
    %c0_i32 = arith.constant 0 : i32
    %c0_i32_0 = arith.constant 0 : i32
    %c0_i32_1 = arith.constant 0 : i32
    return %c0_i32, %c0_i32_0 : i32, i32
  }
  func.func @transform_5(%arg0: i32) -> (i32, i32) {
    %c0_i32 = arith.constant 0 : i32
    %c0_i32_0 = arith.constant 0 : i32
    %c0_i32_1 = arith.constant 0 : i32
    return %c0_i32, %c0_i32_0 : i32, i32
  }
  func.func @transform_6(%arg0: i32) -> (i32, i32) {
    %c0_i32 = arith.constant 0 : i32
    %c0_i32_0 = arith.constant 0 : i32
    return %arg0, %c0_i32 : i32, i32
  }
}

module attributes {stable_mosaic.version = 11 : i64} {
  func.func @_ffn_res_ln_kernel(%arg0: i32, %arg1: i32, %arg2: memref<8x32xf32, #tpu.memory_space<vmem>>, %arg3: memref<32x64xf32, #tpu.memory_space<vmem>>, %arg4: memref<1x64xf32, #tpu.memory_space<vmem>>, %arg5: memref<64x32xf32, #tpu.memory_space<vmem>>, %arg6: memref<1x32xf32, #tpu.memory_space<vmem>>, %arg7: memref<1x32xf32, #tpu.memory_space<vmem>>, %arg8: memref<1x32xf32, #tpu.memory_space<vmem>>, %arg9: memref<8x32xf32, #tpu.memory_space<vmem>>, %arg10: memref<8x32xf32, #tpu.memory_space<vmem>>) attributes {dimension_semantics = [#tpu.dimension_semantics<parallel>, #tpu.dimension_semantics<arbitrary>], iteration_bounds = array<i64: 2, 1>, scalar_prefetch = 0 : i64, scratch_operands = 1 : i64, tpu.core_type = #tpu.core_type<tc>, window_params = [{transform_indices = @transform_0, window_bounds = array<i64: 8, 32>}, {transform_indices = @transform_1, window_bounds = array<i64: 32, 64>}, {transform_indices = @transform_2, window_bounds = array<i64: 1, 64>}, {transform_indices = @transform_3, window_bounds = array<i64: 64, 32>}, {pipeline_mode = #tpu.pipeline_mode<synchronous>, transform_indices = @transform_4, window_bounds = array<i64: 1, 32>}, {pipeline_mode = #tpu.pipeline_mode<synchronous>, transform_indices = @transform_5, window_bounds = array<i64: 1, 32>}, {pipeline_mode = #tpu.pipeline_mode<synchronous>, transform_indices = @transform_6, window_bounds = array<i64: 1, 32>}, {transform_indices = @transform_7, window_bounds = array<i64: 8, 32>}]} {
    %c0_i32 = arith.constant 0 : i32
    %0 = arith.cmpi eq, %arg1, %c0_i32 : i32
    %1 = arith.extui %0 : i1 to i32
    %c0_i32_0 = arith.constant 0 : i32
    %2 = arith.cmpi ne, %1, %c0_i32_0 : i32
    scf.if %2 {
      %cst_17 = arith.constant 0.000000e+00 : f32
      %22 = vector.broadcast %cst_17 : f32 to vector<8x32xf32>
      %c0_18 = arith.constant 0 : index
      %c0_19 = arith.constant 0 : index
      %23 = vector.load %arg10[%c0_18, %c0_19] : memref<8x32xf32, #tpu.memory_space<vmem>>, vector<8x32xf32>
      tpu.vector_store %arg10[%c0_18, %c0_19], %22 {strides = array<i32>} : memref<8x32xf32, #tpu.memory_space<vmem>>, vector<8x32xf32>,
    } else {
    }
    %c0 = arith.constant 0 : index
    %c0_1 = arith.constant 0 : index
    %3 = vector.load %arg2[%c0, %c0_1] : memref<8x32xf32, #tpu.memory_space<vmem>>, vector<8x32xf32>
    %c0_2 = arith.constant 0 : index
    %c0_3 = arith.constant 0 : index
    %4 = vector.load %arg3[%c0_2, %c0_3] : memref<32x64xf32, #tpu.memory_space<vmem>>, vector<32x64xf32>
    %cst = arith.constant dense<0.000000e+00> : vector<8x64xf32>
    %5 = tpu.matmul %3, %4, %cst {dimension_numbers = #tpu.dot_dimension_numbers<[1], [0], [0], [1], [0, 0, 1, 1], [], []>} : vector<8x32xf32>, vector<32x64xf32>, vector<8x64xf32> -> vector<8x64xf32>
    %c0_4 = arith.constant 0 : index
    %c0_5 = arith.constant 0 : index
    %6 = vector.load %arg4[%c0_4, %c0_5] : memref<1x64xf32, #tpu.memory_space<vmem>>, vector<1x64xf32>
    %7 = vector.broadcast %6 : vector<1x64xf32> to vector<8x64xf32>
    %8 = arith.addf %5, %7 : vector<8x64xf32>
    %cst_6 = arith.constant 0.000000e+00 : f32
    %9 = vector.broadcast %cst_6 : f32 to vector<8x64xf32>
    %10 = arith.cmpf oge, %8, %9 : vector<8x64xf32>
    %cst_7 = arith.constant 0.00999999977 : f32
    %11 = vector.broadcast %cst_7 : f32 to vector<8x64xf32>
    %12 = arith.mulf %11, %8 : vector<8x64xf32>
    %13 = arith.select %10, %8, %12 : vector<8x64xi1>, vector<8x64xf32>
    %c0_8 = arith.constant 0 : index
    %c0_9 = arith.constant 0 : index
    %14 = vector.load %arg10[%c0_8, %c0_9] : memref<8x32xf32, #tpu.memory_space<vmem>>, vector<8x32xf32>
    %c0_10 = arith.constant 0 : index
    %c0_11 = arith.constant 0 : index
    %15 = vector.load %arg5[%c0_10, %c0_11] : memref<64x32xf32, #tpu.memory_space<vmem>>, vector<64x32xf32>
    %cst_12 = arith.constant dense<0.000000e+00> : vector<8x32xf32>
    %16 = tpu.matmul %13, %15, %cst_12 {dimension_numbers = #tpu.dot_dimension_numbers<[1], [0], [0], [1], [0, 0, 1, 1], [], []>} : vector<8x64xf32>, vector<64x32xf32>, vector<8x32xf32> -> vector<8x32xf32>
    %17 = arith.addf %14, %16 : vector<8x32xf32>
    %c0_13 = arith.constant 0 : index
    %c0_14 = arith.constant 0 : index
    %18 = vector.load %arg10[%c0_13, %c0_14] : memref<8x32xf32, #tpu.memory_space<vmem>>, vector<8x32xf32>
    tpu.vector_store %arg10[%c0_13, %c0_14], %17 {strides = array<i32>} : memref<8x32xf32, #tpu.memory_space<vmem>>, vector<8x32xf32>,
    %c0_i32_15 = arith.constant 0 : i32
    %19 = arith.cmpi eq, %arg1, %c0_i32_15 : i32
    %20 = arith.extui %19 : i1 to i32
    %c0_i32_16 = arith.constant 0 : i32
    %21 = arith.cmpi ne, %20, %c0_i32_16 : i32
    scf.if %21 {
      %c0_17 = arith.constant 0 : index
      %c0_18 = arith.constant 0 : index
      %22 = vector.load %arg10[%c0_17, %c0_18] : memref<8x32xf32, #tpu.memory_space<vmem>>, vector<8x32xf32>
      %23 = arith.addf %3, %22 : vector<8x32xf32>
      %c0_19 = arith.constant 0 : index
      %c0_20 = arith.constant 0 : index
      %24 = vector.load %arg6[%c0_19, %c0_20] : memref<1x32xf32, #tpu.memory_space<vmem>>, vector<1x32xf32>
      %25 = vector.broadcast %24 : vector<1x32xf32> to vector<8x32xf32>
      %26 = arith.addf %23, %25 : vector<8x32xf32>
      %cst_21 = arith.constant dense<0.000000e+00> : vector<8xf32>
      %27 = vector.multi_reduction <add>, %26, %cst_21 [1] : vector<8x32xf32> to vector<8xf32>
      %28 = vector.shape_cast %27 : vector<8xf32> to vector<8x1xf32>
      %cst_22 = arith.constant 3.200000e+01 : f32
      %29 = vector.broadcast %cst_22 : f32 to vector<8x1xf32>
      %30 = arith.divf %28, %29 : vector<8x1xf32>
      %31 = vector.broadcast %30 : vector<8x1xf32> to vector<8x32xf32>
      %32 = arith.subf %26, %31 : vector<8x32xf32>
      %33 = arith.mulf %32, %32 : vector<8x32xf32>
      %cst_23 = arith.constant dense<0.000000e+00> : vector<8xf32>
      %34 = vector.multi_reduction <add>, %33, %cst_23 [1] : vector<8x32xf32> to vector<8xf32>
      %35 = vector.shape_cast %34 : vector<8xf32> to vector<8x1xf32>
      %cst_24 = arith.constant 3.200000e+01 : f32
      %36 = vector.broadcast %cst_24 : f32 to vector<8x1xf32>
      %37 = arith.divf %35, %36 : vector<8x1xf32>
      %38 = vector.broadcast %30 : vector<8x1xf32> to vector<8x32xf32>
      %39 = arith.subf %26, %38 : vector<8x32xf32>
      %cst_25 = arith.constant 9.99999974E-6 : f32
      %40 = vector.broadcast %cst_25 : f32 to vector<8x1xf32>
      %41 = arith.addf %37, %40 : vector<8x1xf32>
      %42 = math.rsqrt %41 : vector<8x1xf32>
      %43 = vector.broadcast %42 : vector<8x1xf32> to vector<8x32xf32>
      %44 = arith.mulf %39, %43 : vector<8x32xf32>
      %c0_26 = arith.constant 0 : index
      %c0_27 = arith.constant 0 : index
      %45 = vector.load %arg7[%c0_26, %c0_27] : memref<1x32xf32, #tpu.memory_space<vmem>>, vector<1x32xf32>
      %46 = vector.broadcast %45 : vector<1x32xf32> to vector<8x32xf32>
      %47 = arith.mulf %44, %46 : vector<8x32xf32>
      %c0_28 = arith.constant 0 : index
      %c0_29 = arith.constant 0 : index
      %48 = vector.load %arg8[%c0_28, %c0_29] : memref<1x32xf32, #tpu.memory_space<vmem>>, vector<1x32xf32>
      %49 = vector.broadcast %48 : vector<1x32xf32> to vector<8x32xf32>
      %50 = arith.addf %47, %49 : vector<8x32xf32>
      %c0_30 = arith.constant 0 : index
      %c0_31 = arith.constant 0 : index
      %51 = vector.load %arg9[%c0_30, %c0_31] : memref<8x32xf32, #tpu.memory_space<vmem>>, vector<8x32xf32>
      tpu.vector_store %arg9[%c0_30, %c0_31], %50 {strides = array<i32>} : memref<8x32xf32, #tpu.memory_space<vmem>>, vector<8x32xf32>,
    } else {
    }
    return
  }
  func.func @transform_0(%arg0: i32, %arg1: i32) -> (i32, i32) {
    %c0_i32 = arith.constant 0 : i32
    %c0_i32_0 = arith.constant 0 : i32
    return %arg0, %c0_i32 : i32, i32
  }
  func.func @transform_1(%arg0: i32, %arg1: i32) -> (i32, i32) {
    %c0_i32 = arith.constant 0 : i32
    %c0_i32_0 = arith.constant 0 : i32
    return %c0_i32, %arg1 : i32, i32
  }
  func.func @transform_2(%arg0: i32, %arg1: i32) -> (i32, i32) {
    %c0_i32 = arith.constant 0 : i32
    %c0_i32_0 = arith.constant 0 : i32
    return %c0_i32, %arg1 : i32, i32
  }
  func.func @transform_3(%arg0: i32, %arg1: i32) -> (i32, i32) {
    %c0_i32 = arith.constant 0 : i32
    %c0_i32_0 = arith.constant 0 : i32
    return %arg1, %c0_i32 : i32, i32
  }
  func.func @transform_4(%arg0: i32, %arg1: i32) -> (i32, i32) {
    %c0_i32 = arith.constant 0 : i32
    %c0_i32_0 = arith.constant 0 : i32
    %c0_i32_1 = arith.constant 0 : i32
    return %c0_i32, %c0_i32_0 : i32, i32
  }
  func.func @transform_5(%arg0: i32, %arg1: i32) -> (i32, i32) {
    %c0_i32 = arith.constant 0 : i32
    %c0_i32_0 = arith.constant 0 : i32
    %c0_i32_1 = arith.constant 0 : i32
    return %c0_i32, %c0_i32_0 : i32, i32
  }
  func.func @transform_6(%arg0: i32, %arg1: i32) -> (i32, i32) {
    %c0_i32 = arith.constant 0 : i32
    %c0_i32_0 = arith.constant 0 : i32
    %c0_i32_1 = arith.constant 0 : i32
    return %c0_i32, %c0_i32_0 : i32, i32
  }
  func.func @transform_7(%arg0: i32, %arg1: i32) -> (i32, i32) {
    %c0_i32 = arith.constant 0 : i32
    %c0_i32_0 = arith.constant 0 : i32
    return %arg0, %c0_i32 : i32, i32
  }
}

</mosaic_0001>

<bundles_post_ra>
// kernel: transformer_block_forward.4
= control target key start
LH: loop header
LB: loop body
LE: loop exit
PB: predicated region body
PF: predicated region fallthrough
CT: control target
= control target key end

     0   :  { %s374_s12 = smov 0   ;;  %s406_s0 = inlined_call_operand.vmem [shape: f32[16,32], index: 0, kind: input, shape index: {}]   ;;  %s407_s1 = inlined_call_operand.vmem [shape: f32[32,96], index: 1, kind: input, shape index: {}]   ;;  %s408_s2 = inlined_call_operand.vmem [shape: f32[1,96], index: 2, kind: input, shape index: {}]   ;;  %s409_s3 = inlined_call_operand.vmem [shape: f32[16,96], index: 3, kind: output, shape index: {}]  }
   0x1 LB: > { %s307_s13 = sadd.s32 4294967295, %s350_s12   ;;  %p311_p0 = scmp.ge.s32.totalorder %s350_s12, 1  ;;  %s350_s12 = sphi %s374_s12, %s13_s12  }
   0x2   : > { %p136_p1 = scmp.lt.s32.totalorder %s350_s12, 3 }
   0x4   : > { %p137_p2 = pnand %p311_p0, %p136_p1 }
   0x5   : > { %p158_p3 = scmp.lt.s32.totalorder (!%p137_p2), %s307_s13, 1 }
   0x6   : > { %140 = sbr.rel (%p137_p2) target bundleno = 216 (0xd8), region = 32 }
   0xb   : > { %v170_v0 = vld [vmem:[%s407_s1 + $0x18] sm:$0xff]  ;;  %v352_v1 = vmov 0.0   ;;  %v169_v2 = vld [vmem:[%s407_s1 + $0x10] sm:$0xff]  ;;  %vm353_vm0 = vmmov 0   ;;  %s411_s13 = smov (!%p158_p3, %s307_s13), 1  ;;  %v168_v3 = vld [vmem:[%s407_s1 + $0x8] sm:$0xff] }
   0xc   : > { %323 = vmatprep.subr.mxu0 %v352_v1  ;;  %331 = vmatprep.mubr.msk.f32.mxu0 %vm353_vm0, %v352_v1  ;;  %s312_s20 = sshll.u32 %s411_s13, 3  ;;  %v167_v4 = vld [vmem:[%s407_s1] sm:$0xff]  ;;  %vm178_vm1 = vcmask 261120   ;;  %vm252_vm2 = vcmask 785408  }
   0xd   : > { %324 = vmatpush3.msra.mxu0 %v170_v0  ;;  %s161_s25 = scalar_lea.vmem %s406_s0, %s312_s20  ;;  %v314_v6 = vld [vmem:[%s408_s2] ss:$0 sm:$0xff]  ;;  %s165_s30 = scalar_lea.vmem %s409_s3, %s312_s20 }
   0xe   : > { %325 = vmatprep.subr.mxu0 %v352_v1  ;;  %v166_v5 = vld [vmem:[%s161_s25] sm:$0xff] }
   0xf   : > { %326 = vmatpush3.msra.mxu0 %v169_v2 }
  0x10   : > { %327 = vmatprep.subr.mxu0 %v352_v1 }
  0x11   : > { %328 = vmatpush3.msra.mxu0 %v168_v3 }
  0x12   : > { %329 = vmatprep.subr.mxu0 %v352_v1 }
  0x13   : > { %330 = vmatpush3.msra.mxu0 %v167_v4 }
  0x14   : > { %332 = vmatmul.mubr.msk.f32.vlgmr.msra.gmra.mxu0 %vm178_vm1, %v166_v5 }
  0xd4   : > { %v248_v7 = vpop.f32.mrf.mxu0 }
  0xd5   : > { %v249_v8 = vadd.f32 %v314_v6, %v248_v7 }
  0xd6   : > { %v333_v9 = vpop.f32.mrf.mxu0 }
  0xd7   : > { %253 = vst.msk [vmem:[%s165_s30] sm:$0xff] %vm252_vm2, %v249_v8 }
  0xd8 PF: > { %s13_s12 = sadd.s32 1, %s350_s12  }
  0xd9   : > { %p10_p4 = scmp.ge.s32.totalorder %s13_s12, 4  }
  0xdb   :  { %12 = sbr.rel (!%p10_p4) target bundleno = 1 (0x1), region = 62 }

// kernel: transformer_block_forward.5
= control target key start
LH: loop header
LB: loop body
LE: loop exit
PB: predicated region body
PF: predicated region fallthrough
CT: control target
= control target key end

     0   :  { %s1010_s6 = smov 0   ;;  %s1100_s0 = inlined_call_operand.vmem [shape: f32[16,96], index: 0, kind: input, shape index: {}]   ;;  %s1101_s1 = inlined_call_operand.vmem [shape: f32[16,32], index: 1, kind: output, shape index: {}]  }
   0x1 LB: > { %s859_s7 = sadd.s32 4294967295, %s982_s6   ;;  %p863_p0 = scmp.ge.s32.totalorder %s982_s6, 1  ;;  %s982_s6 = sphi %s1010_s6, %s11_s6  }
   0x2   : > { %p86_p1 = scmp.lt.s32.totalorder %s982_s6, 3 }
   0x4   : > { %p87_p2 = pnand %p863_p0, %p86_p1 }
   0x5   : > { %p104_p3 = scmp.lt.s32.totalorder (!%p87_p2), %s859_s7, 1  ;;  %s986_s12 = smov (!%p87_p2), 96  }
   0x6   : > { %90 = sbr.rel (%p87_p2) target bundleno = 1156 (0x484), region = 24  ;;  %s987_s13 = smov (!%p87_p2), 64  }
   0x7   : > { %s988_s14 = smov (!%p87_p2), 88   ;;  %s989_s15 = smov (!%p87_p2), 120  }
   0x8   : > { %s990_s16 = smov (!%p87_p2), 80   ;;  %s991_s17 = smov (!%p87_p2), 112  }
   0x9   : > { %s992_s18 = smov (!%p87_p2), 72   ;;  %s993_s19 = smov (!%p87_p2), 104  }
   0xa   : > { %s994_s20 = smov (!%p87_p2), 56   ;;  %s995_s21 = smov (!%p87_p2), 48  }
   0xb   : > { %v984_v0 = vmov 0.0   ;;  %vm985_vm0 = vmmov 0   ;;  %s1103_s7 = smov (!%p104_p3, %s859_s7), 1  ;;  %vm117_vm1 = vcmask 64512   ;;  %s996_s22 = smov 40   ;;  %vm454_vm2 = vcmask 130112  }
   0xc   : > { %896 = vmatprep.subr.mxu0 %v984_v0  ;;  %898 = vmatprep.mubr.msk.f32.mxu0 %vm985_vm0, %v984_v0  ;;  %s864_s8 = sshll.u32 %s1103_s7, 3  ;;  %s997_s26 = smov 8   ;;  %vm629_vm3 = vcmask 195712   ;;  %vm804_vm4 = vcmask 261312  }
   0xd   : > { %901 = vmatprep.subr.mxu1 %v984_v0  ;;  %903 = vmatprep.mubr.msk.f32.mxu1 %vm985_vm0, %v984_v0  ;;  %s107_s11 = scalar_lea.vmem %s1100_s0, %s864_s8  ;;  %s1090_s25 = scalar_lea.vmem %s1101_s1, %s864_s8 }
   0xe   : > { %v1032_v1 = vld [vmem:[%s107_s11] sm:$0xff]  ;;  %s998_s27 = smov 16   ;;  %s999_s28 = smov 24  }
   0xf   : > { %115 = vrot.lane.b32.xlu0 %v1032_v1, %s986_s12  ;;  %v113_v2 = vmul.f32 0.35355338, %v1032_v1  ;;  %202 = vrot.lane.b32.xlu1 %v1032_v1, %s987_s13 }
  0x13   : > { %287 = vrot.lane.b32.xlu1 %v1032_v1, %s988_s14 }
  0x17   : > { %284 = vrot.lane.b32.xlu1 %v113_v2, %s989_s15 }
  0x1b   : > { %462 = vrot.lane.b32.xlu1 %v1032_v1, %s990_s16 }
  0x1f   : > { %459 = vrot.lane.b32.xlu1 %v113_v2, %s991_s17 }
  0x23   : > { %637 = vrot.lane.b32.xlu1 %v1032_v1, %s992_s18 }
  0x27   : > { %634 = vrot.lane.b32.xlu1 %v113_v2, %s993_s19 }
  0x81   : > { %v116_v3 = vpop.permute.xlu0 %115  ;;  %v203_v7 = vpop.permute.xlu1 %202 }
  0x82   : > { %897 = vmatpush3.xpose.msk.msra.mxu0 %vm117_vm1, %v116_v3  ;;  %902 = vmatpush3.msra.mxu1 %v203_v7 }
  0x83   : > { %911 = vmatprep.subr.mxu0 %v984_v0  ;;  %906 = vmatprep.subr.mxu1 %v984_v0 }
  0x85   : > { %899 = vmatmul.mubr.msk.f32.vlgmr.msra.gmra.mxu0 %vm117_vm1, %v113_v2  ;;  %v288_v8 = vpop.permute.xlu1 %287 }
  0x86   : > { %913 = vmatprep.mubr.msk.f32.mxu0 %vm985_vm0, %v984_v0 }
  0x89   : > { %v285_v12 = vpop.permute.xlu1 %284 }
  0x8d   : > { %v463_v13 = vpop.permute.xlu1 %462 }
  0x91   : > { %v460_v14 = vpop.permute.xlu1 %459 }
  0x95   : > { %v638_v16 = vpop.permute.xlu1 %637 }
  0x99   : > { %v635_v17 = vpop.permute.xlu1 %634 }
 0x145   : > { %v189_v4 = vpop.f32.mrf.mxu0 }
 0x146   : > { %v193_v5 = vsel %vm117_vm1, %v189_v4, -inf }
 0x147   : > { %194 = vmax.xlane.f32.xlu0 %v193_v5  ;;  %v900_v6 = vpop.f32.mrf.mxu0 }
 0x15d   : > { %372 = vrot.lane.b32.xlu0 %v1032_v1, %s994_s20 }
 0x1d0   : > { %v195_v9 = vpop.xlane.xlu0 %194 }
 0x1d1   : > { %v196_v10 = vsub.f32 %v189_v4, %v195_v9 }
 0x1d3   : > { %v197_v11 = vmul.f32 1.442695, %v196_v10 }
 0x1d4   : > { %v373_v18 = vpop.permute.xlu0 %372 }
 0x1d5   : > { %960 = vpow2.f32 %v197_v11  ;;  %912 = vmatpush3.msra.mxu0 %v373_v18 }
 0x1d6   : > { %921 = vmatprep.subr.mxu0 %v984_v0 }
 0x1e2   : > { %v1048_v15 = vpop.eup %960 }
 0x1e3   : > { %904 = vmatmul.mubr.msk.f32.vlgmr.msra.gmra.mxu1 %vm117_vm1, %v1048_v15  ;;  %v199_v47 = vsel %vm117_vm1, %v1048_v15, 0.0 }
 0x1e4   : > { %907 = vmatpush3.xpose.msk.msra.mxu1 %vm117_vm1, %v288_v8  ;;  %908 = vmatprep.mubr.msk.f32.mxu1 %vm985_vm0, %v984_v0 }
 0x1e5   : > { %916 = vmatprep.subr.mxu1 %v984_v0 }
 0x1e7   : > { %909 = vmatmul.mubr.msk.f32.vlgmr.msra.gmra.mxu1 %vm117_vm1, %v285_v12 }
 0x1e8   : > { %917 = vmatpush3.xpose.msk.msra.mxu1 %vm117_vm1, %v463_v13  ;;  %918 = vmatprep.mubr.msk.f32.mxu1 %vm985_vm0, %v984_v0 }
 0x1e9   : > { %926 = vmatprep.subr.mxu1 %v984_v0 }
 0x1eb   : > { %919 = vmatmul.mubr.msk.f32.vlgmr.msra.gmra.mxu1 %vm117_vm1, %v460_v14 }
 0x1ec   : > { %927 = vmatpush3.xpose.msk.msra.mxu1 %vm117_vm1, %v638_v16  ;;  %928 = vmatprep.mubr.msk.f32.mxu1 %vm985_vm0, %v984_v0 }
 0x1ef   : > { %929 = vmatmul.mubr.msk.f32.vlgmr.msra.gmra.mxu1 %vm117_vm1, %v635_v17 }
 0x2a3   : > { %v274_v19 = vpop.f32.mrf.mxu1 }
 0x2a5   : > { %v905_v20 = vpop.f32.mrf.mxu1 }
 0x2a7   : > { %v359_v21 = vpop.f32.mrf.mxu1 }
 0x2a8   : > { %v363_v22 = vsel %vm117_vm1, %v359_v21, -inf }
 0x2a9   : > { %364 = vmax.xlane.f32.xlu1 %v363_v22  ;;  %v910_v23 = vpop.f32.mrf.mxu1 }
 0x2ab   : > { %v534_v24 = vpop.f32.mrf.mxu1 }
 0x2ac   : > { %v538_v25 = vsel %vm117_vm1, %v534_v24, -inf }
 0x2ad   : > { %539 = vmax.xlane.f32.xlu0 %v538_v25  ;;  %v920_v26 = vpop.f32.mrf.mxu1 }
 0x2af   : > { %v709_v27 = vpop.f32.mrf.mxu1 }
 0x2b0   : > { %v713_v28 = vsel %vm117_vm1, %v709_v27, -inf }
 0x2b1   : > { %714 = vmax.xlane.f32.xlu0 %v713_v28  ;;  %v930_v29 = vpop.f32.mrf.mxu1 }
 0x2ba   : > { %547 = vrot.lane.b32.xlu1 %v1032_v1, %s995_s21 }
 0x2c7   : > { %722 = vrot.lane.b32.xlu0 %v1032_v1, %s996_s22 }
 0x332   : > { %v365_v30 = vpop.xlane.xlu1 %364 }
 0x333   : > { %v366_v31 = vsub.f32 %v359_v21, %v365_v30 }
 0x335   : > { %v367_v32 = vmul.f32 1.442695, %v366_v31 }
 0x336   : > { %v540_v33 = vpop.xlane.xlu0 %539  ;;  %v548_v39 = vpop.permute.xlu1 %547 }
 0x337   : > { %962 = vpow2.f32 %v367_v32  ;;  %v541_v34 = vsub.f32 %v534_v24, %v540_v33 }
 0x339   : > { %v542_v35 = vmul.f32 1.442695, %v541_v34 }
 0x33a   : > { %v715_v36 = vpop.xlane.xlu0 %714 }
 0x33b   : > { %964 = vpow2.f32 %v542_v35  ;;  %v716_v37 = vsub.f32 %v709_v27, %v715_v36 }
 0x33d   : > { %v717_v38 = vmul.f32 1.442695, %v716_v37 }
 0x33e   : > { %v723_v42 = vpop.permute.xlu0 %722 }
 0x33f   : > { %966 = vpow2.f32 %v717_v38 }
 0x344   : > { %v963_v40 = vpop.eup %962 }
 0x345   : > { %914 = vmatmul.mubr.msk.f32.vlgmr.msra.gmra.mxu0 %vm117_vm1, %v963_v40  ;;  %v369_v41 = vsel %vm117_vm1, %v963_v40, 0.0 }
 0x346   : > { %922 = vmatpush3.msra.mxu0 %v548_v39  ;;  %370 = vadd.xlane.f32.xlu0 %v369_v41 }
 0x347   : > { %923 = vmatprep.mubr.msk.f32.mxu0 %vm985_vm0, %v984_v0  ;;  %931 = vmatprep.subr.mxu0 %v984_v0 }
 0x348   : > { %v965_v43 = vpop.eup %964 }
 0x349   : > { %924 = vmatmul.mubr.msk.f32.vlgmr.msra.gmra.mxu0 %vm117_vm1, %v965_v43  ;;  %v544_v44 = vsel %vm117_vm1, %v965_v43, 0.0 }
 0x34a   : > { %932 = vmatpush3.msra.mxu0 %v723_v42  ;;  %545 = vadd.xlane.f32.xlu1 %v544_v44 }
 0x34b   : > { %933 = vmatprep.mubr.msk.f32.mxu0 %vm985_vm0, %v984_v0 }
 0x34c   : > { %v967_v45 = vpop.eup %966 }
 0x34d   : > { %934 = vmatmul.mubr.msk.f32.vlgmr.msra.gmra.mxu0 %vm117_vm1, %v967_v45  ;;  %v719_v46 = vsel %vm117_vm1, %v967_v45, 0.0 }
 0x34e   : > { %720 = vadd.xlane.f32.xlu0 %v719_v46 }
 0x352   : > { %200 = vadd.xlane.f32.xlu0 %v199_v47 }
 0x3cf   : > { %v371_v48 = vpop.xlane.xlu0 %370 }
 0x3d3   : > { %v546_v53 = vpop.xlane.xlu1 %545 }
 0x3d7   : > { %v721_v49 = vpop.xlane.xlu0 %720 }
 0x3db   : > { %v201_v50 = vpop.xlane.xlu0 %200 }
 0x3dc   : > { %968 = vrcp.f32 %v201_v50 }
 0x3dd   : > { %970 = vrcp.f32 %v371_v48 }
 0x3de   : > { %972 = vrcp.f32 %v546_v53 }
 0x3df   : > { %974 = vrcp.f32 %v721_v49 }
 0x3e9   : > { %v969_v51 = vpop.eup %968 }
 0x3ea   : > { %v279_v52 = vmul.f32 %v969_v51, %v274_v19  ;;  %v971_v54 = vpop.eup %970 }
 0x3eb   : > { %v973_v58 = vpop.eup %972 }
 0x3ec   : > { %280 = vst.msk [vmem:[%s1090_s25] sm:$0xff] %vm117_vm1, %v279_v52  ;;  %v975_v62 = vpop.eup %974 }
 0x405   : > { %v444_v55 = vpop.f32.mrf.mxu0 }
 0x406   : > { %v449_v56 = vmul.f32 %v971_v54, %v444_v55 }
 0x407   : > { %v915_v57 = vpop.f32.mrf.mxu0 }
 0x408   : > { %451 = vrot.lane.b32.xlu0 %v449_v56, %s997_s26 }
 0x409   : > { %v619_v59 = vpop.f32.mrf.mxu0 }
 0x40a   : > { %v624_v60 = vmul.f32 %v973_v58, %v619_v59 }
 0x40b   : > { %v925_v61 = vpop.f32.mrf.mxu0 }
 0x40c   : > { %626 = vrot.lane.b32.xlu1 %v624_v60, %s998_s27 }
 0x40d   : > { %v794_v63 = vpop.f32.mrf.mxu0 }
 0x40e   : > { %v799_v0 = vmul.f32 %v975_v62, %v794_v63 }
 0x40f   : > { %v935_v1 = vpop.f32.mrf.mxu0 }
 0x410   : > { %801 = vrot.lane.b32.xlu0 %v799_v0, %s999_s28 }
 0x47a   : > { %v452_v2 = vpop.permute.xlu0 %451 }
 0x47b   : > { %455 = vst.msk [vmem:[%s1090_s25] sm:$0xff] %vm454_vm2, %v452_v2 }
 0x47e   : > { %v627_v3 = vpop.permute.xlu1 %626 }
 0x47f   : > { %630 = vst.msk [vmem:[%s1090_s25] sm:$0xff] %vm629_vm3, %v627_v3 }
 0x482   : > { %v802_v4 = vpop.permute.xlu0 %801 }
 0x483   : > { %805 = vst.msk [vmem:[%s1090_s25] sm:$0xff] %vm804_vm4, %v802_v4 }
 0x484 PF: > { %s11_s6 = sadd.s32 1, %s982_s6  }
 0x485   : > { %p8_p4 = scmp.ge.s32.totalorder %s11_s6, 4  }
 0x487   :  { %10 = sbr.rel (!%p8_p4) target bundleno = 1 (0x1), region = 54 }

// kernel: transformer_block_forward.6
= control target key start
LH: loop header
LB: loop body
LE: loop exit
PB: predicated region body
PF: predicated region fallthrough
CT: control target
= control target key end

     0   :  { %s535_s21 = smov 0   ;;  %s585_s0 = inlined_call_operand.vmem [shape: f32[16,32], index: 0, kind: input, shape index: {}]   ;;  %s586_s1 = inlined_call_operand.vmem [shape: f32[16,32], index: 1, kind: input, shape index: {}]   ;;  %s587_s2 = inlined_call_operand.vmem [shape: f32[32,32], index: 2, kind: input, shape index: {}]   ;;  %s588_s3 = inlined_call_operand.vmem [shape: f32[1,32], index: 3, kind: input, shape index: {}]   ;;  %s589_s4 = inlined_call_operand.vmem [shape: f32[1,32], index: 4, kind: input, shape index: {}]   ;;  %s590_s5 = inlined_call_operand.vmem [shape: f32[1,32], index: 5, kind: input, shape index: {}]   ;;  %s591_s6 = inlined_call_operand.vmem [shape: f32[16,32], index: 6, kind: output, shape index: {}]  }
   0x1 LB: > { %s448_s22 = sadd.s32 4294967295, %s496_s21   ;;  %p452_p0 = scmp.ge.s32.totalorder %s496_s21, 1  ;;  %s496_s21 = sphi %s535_s21, %s16_s21  }
   0x2   : > { %p220_p1 = scmp.lt.s32.totalorder %s496_s21, 3 }
   0x4   : > { %p221_p2 = pnand %p452_p0, %p220_p1 }
   0x5   : > { %p252_p3 = scmp.lt.s32.totalorder (!%p221_p2), %s448_s22, 1 }
   0x6   : > { %224 = sbr.rel (%p221_p2) target bundleno = 526 (0x20e), region = 44 }
   0xb   : > { %v268_v0 = vld [vmem:[%s587_s2 + $0x18] sm:$0xff]  ;;  %v498_v1 = vmov 0.0   ;;  %v267_v2 = vld [vmem:[%s587_s2 + $0x10] sm:$0xff]  ;;  %vm499_vm0 = vmmov 0   ;;  %s593_s22 = smov (!%p252_p3, %s448_s22), 1  ;;  %v266_v3 = vld [vmem:[%s587_s2 + $0x8] sm:$0xff] }
   0xc   : > { %467 = vmatprep.subr.mxu0 %v498_v1  ;;  %475 = vmatprep.mubr.msk.f32.mxu0 %vm499_vm0, %v498_v1  ;;  %s552_s29 = sshll.u32 %s593_s22, 3  ;;  %v265_v4 = vld [vmem:[%s587_s2] sm:$0xff]  ;;  %vm276_vm1 = vcmask 261120  }
   0xd   : > { %468 = vmatpush3.msra.mxu0 %v268_v0  ;;  %s255_s10 = scalar_lea.vmem %s585_s0, %s552_s29  ;;  %s259_s13 = scalar_lea.vmem %s586_s1, %s552_s29  ;;  %v456_v6 = vld [vmem:[%s588_s3] ss:$0 sm:$0xff] }
   0xe   : > { %469 = vmatprep.subr.mxu0 %v498_v1  ;;  %v264_v5 = vld [vmem:[%s255_s10] sm:$0xff]  ;;  %s263_s23 = scalar_lea.vmem %s591_s6, %s552_s29 }
   0xf   : > { %470 = vmatpush3.msra.mxu0 %v267_v2  ;;  %v350_v8 = vld [vmem:[%s259_s13] sm:$0xff] }
  0x10   : > { %471 = vmatprep.subr.mxu0 %v498_v1  ;;  %v458_v22 = vld [vmem:[%s589_s4] ss:$0 sm:$0xff] }
  0x11   : > { %472 = vmatpush3.msra.mxu0 %v266_v3  ;;  %v459_v24 = vld [vmem:[%s590_s5] ss:$0 sm:$0xff] }
  0x12   : > { %473 = vmatprep.subr.mxu0 %v498_v1 }
  0x13   : > { %474 = vmatpush3.msra.mxu0 %v265_v4 }
  0x14   : > { %476 = vmatmul.mubr.msk.f32.vlgmr.msra.gmra.mxu0 %vm276_vm1, %v264_v5 }
  0xd4   : > { %v346_v7 = vpop.f32.mrf.mxu0 }
  0xd5   : > { %v347_v9 = vadd.f32 %v456_v6, %v346_v7 }
  0xd6   : > { %v477_v10 = vpop.f32.mrf.mxu0 }
  0xd7   : > { %v351_v11 = vadd.f32 %v350_v8, %v347_v9 }
  0xd9   : > { %v352_v12 = vsel %vm276_vm1, %v351_v11, 0.0 }
  0xda   : > { %353 = vadd.xlane.f32.xlu0 %v352_v12 }
 0x163   : > { %v354_v13 = vpop.xlane.xlu0 %353 }
 0x164   : > { %v356_v14 = vmul.f32 0.03125, %v354_v13 }
 0x166   : > { %v357_v15 = vsub.f32 %v351_v11, %v356_v14 }
 0x168   : > { %v358_v16 = vmul.f32 %v357_v15, %v357_v15 }
 0x16a   : > { %v359_v17 = vsel %vm276_vm1, %v358_v16, 0.0 }
 0x16b   : > { %360 = vadd.xlane.f32.xlu0 %v359_v17 }
 0x1f4   : > { %v361_v18 = vpop.xlane.xlu0 %360 }
 0x1f5   : > { %v362_v19 = vmul.f32 0.03125, %v361_v18 }
 0x1f7   : > { %v363_v20 = vadd.f32 1e-05, %v362_v19 }
 0x1f9   : > { %488 = vrsqrt.f32 %v363_v20 }
 0x206   : > { %v489_v21 = vpop.eup %488 }
 0x207   : > { %v365_v23 = vmul.f32 %v489_v21, %v357_v15 }
 0x209   : > { %v373_v25 = vmul.f32 %v458_v22, %v365_v23 }
 0x20b   : > { %v381_v26 = vadd.f32 %v459_v24, %v373_v25 }
 0x20d   : > { %382 = vst.msk [vmem:[%s263_s23] sm:$0xff] %vm276_vm1, %v381_v26 }
 0x20e PF: > { %s16_s21 = sadd.s32 1, %s496_s21  }
 0x20f   : > { %p13_p4 = scmp.ge.s32.totalorder %s16_s21, 4  }
 0x211   :  { %15 = sbr.rel (!%p13_p4) target bundleno = 1 (0x1), region = 77 }

// kernel: transformer_block_forward.7
= control target key start
LH: loop header
LB: loop body
LE: loop exit
PB: predicated region body
PF: predicated region fallthrough
CT: control target
= control target key end

     0   :  { %12 = vsyncpa [#allocation4], 0  ;;  %s1085_s0 = inlined_call_operand.vmem [shape: f32[16,32], index: 0, kind: input, shape index: {}]   ;;  %s1086_s1 = inlined_call_operand.vmem [shape: f32[32,64], index: 1, kind: input, shape index: {}]   ;;  %s1087_s2 = inlined_call_operand.vmem [shape: f32[1,64], index: 2, kind: input, shape index: {}]   ;;  %s1088_s3 = inlined_call_operand.vmem [shape: f32[64,32], index: 3, kind: input, shape index: {}]   ;;  %s1089_s4 = inlined_call_operand.vmem [shape: f32[1,32], index: 4, kind: input, shape index: {}]   ;;  %s1090_s5 = inlined_call_operand.vmem [shape: f32[1,32], index: 5, kind: input, shape index: {}]   ;;  %s1091_s6 = inlined_call_operand.vmem [shape: f32[1,32], index: 6, kind: input, shape index: {}]   ;;  %s1092_s7 = inlined_call_operand.hbm [shape: f32[16,32], index: 7, kind: output, shape index: {}]  }
   0x1   :  { %14 = vsyncpa [#allocation4 + $0x1], 0  ;;  %s930_s24 = smov 0   ;;  %s932_s25 = smov 0  }
   0x2   :  { %s934_s26 = smov 0   ;;  %s936_s27 = smov 0  }
   0x3   :  { %s938_s28 = smov 0   ;;  %s940_s29 = smov 0  }
   0x4 LB: > { %s686_s30 = sadd.s32 4294967295, %s885_s29   ;;  %s687_s8 = sadd.s32 4294967294, %s885_s29   ;;  %s885_s29 = sphi %s940_s29, %s20_s29   ;;  %s881_s28 = sphi %s938_s28, %s1099_s28   ;;  %s877_s27 = sphi %s936_s27, %s1098_s27   ;;  %s873_s26 = sphi %s934_s26, %s1097_s26   ;;  %s869_s25 = sphi %s932_s25, %s1096_s25   ;;  %s865_s24 = sphi %s930_s24, %s1095_s24  }
   0x5   : > { %s32_s9 = sadd.s32 1, %s881_s28  ;;  %s206_s10 = sadd.s32 1, %s873_s26 }
   0x6   : > { %p34_p0 = scmp.ge.s32.totalorder %s32_s9, 2  ;;  %p216_p1 = scmp.ne.s32.totalorder %s873_s26, %s869_s25 }
   0x7   : > { %p217_p2 = scmp.eq.s32.totalorder %s686_s30, 1  ;;  %p222_p3 = scmp.ne.s32.totalorder %s869_s25, %s865_s24 }
   0x8   : > { %s1101_s9 = smov (%p34_p0, %s32_s9), 0  ;;  %p223_p5 = scmp.eq.s32.totalorder %s687_s8, 1 }
   0x9   : > { %p970_p4 = por %p217_p2, %p216_p1  ;;  %s203_s12 = ssub.s32 %s881_s28, %s1101_s9 }
   0xa   : > { %p693_p6 = scmp.ge.s32.totalorder %s885_s29, 1  ;;  %p204_p7 = scmp.eq.s32.totalorder %s203_s12, 0 }
   0xb   : > { %p977_p8 = por %p223_p5, %p222_p3  ;;  %p279_p9 = scmp.lt.s32.totalorder %s885_s29, 3 }
   0xc   : > { %s983_s14 = scalar_select %p204_p7, %s873_s26, %s206_s10  }
   0xd   : > { %p280_p10 = pnand %p693_p6, %p279_p9 }
   0xe   : > { %p322_p11 = scmp.lt.s32.totalorder (!%p280_p10), %s877_s27, 1  ;;  %s703_s15 = sshll.u32 (!%p280_p10), %s877_s27, 7 }
   0xf   : > { %283 = sbr.rel (%p280_p10) target bundleno = 755 (0x2f3), region = 48  ;;  %s889_s8 = smov (!%p280_p10), [#allocation3]  }
  0x14   : > { %v349_v0 = vld [vmem:[%s1086_s1 + $0x18] sm:$0xff]  ;;  %v887_v1 = vmov 0.0   ;;  %v348_v2 = vld [vmem:[%s1086_s1 + $0x10] sm:$0xff]  ;;  %vm888_vm0 = vmmov 0   ;;  %vm343_vm1 = vcmask 261120   ;;  %s323_s21 = scalar_select %p322_p11, %s877_s27, 1 }
  0x15   : > { %720 = vmatprep.subr.mxu0 %v887_v1  ;;  %728 = vmatprep.mubr.msk.f32.mxu0 %vm888_vm0, %v887_v1  ;;  %v442_v3 = vld [vmem:[%s1088_s3 + $0x38] sm:$0xff]  ;;  %344 = vst.msk [vmem:[#allocation2] sm:$0xff] %vm343_vm1, %v887_v1  ;;  %v441_v4 = vld [vmem:[%s1088_s3 + $0x30] sm:$0xff]  ;;  %v347_v5 = vld [vmem:[%s1086_s1 + $0x8] sm:$0xff]  ;;  %vm443_vm3 = vcmask 523264  }
  0x16   : > { %721 = vmatpush3.msra.mxu0 %v349_v0  ;;  %731 = vmatprep.subr.mxu1 %v887_v1  ;;  %s695_s10 = sshll.u32 %s323_s21, 3  ;;  %v440_v6 = vld [vmem:[%s1088_s3 + $0x28] sm:$0xff]  ;;  %v346_v7 = vld [vmem:[%s1086_s1] sm:$0xff]  ;;  %v438_v10 = vld [vmem:[%s1088_s3 + $0x18] sm:$0xff]  ;;  %s319_s21 = sand.u32 1, %s869_s25  }
  0x17   : > { %722 = vmatprep.subr.mxu0 %v887_v1  ;;  %732 = vmatpush3.msra.mxu1 %v442_v3  ;;  %s325_s20 = scalar_lea.vmem %s1085_s0, %s695_s10  ;;  %v439_v9 = vld [vmem:[%s1088_s3 + $0x20] sm:$0xff]  ;;  %v437_v11 = vld [vmem:[%s1088_s3 + $0x10] sm:$0xff]  ;;  %v436_v12 = vld [vmem:[%s1088_s3 + $0x8] sm:$0xff]  ;;  %s694_s23 = sshll.u32 %s319_s21, 3 }
  0x18   : > { %723 = vmatpush3.msra.mxu0 %v348_v2  ;;  %733 = vmatprep.subr.mxu1 %v887_v1  ;;  %v345_v8 = vld [vmem:[%s325_s20] sm:$0xff]  ;;  %s321_s16 = scalar_lea.vmem [#allocation3], %s694_s23  ;;  %s575_s20 = scalar_lea.hbm %s1092_s7, %s703_s15 }
  0x19   : > { %724 = vmatprep.subr.mxu0 %v887_v1  ;;  %734 = vmatpush3.msra.mxu1 %v441_v4  ;;  %v435_v13 = vld [vmem:[%s1088_s3] sm:$0xff]  ;;  %s577_s17 = sshll.u32 %s321_s16, 4  ;;  %s564_s22 = scalar_lea.sflag [#allocation4], %s319_s21  ;;  %s578_s17 = int_to_ptr.vmem [resolvable:$true] %s577_s17 }
  0x1a   : > { %725 = vmatpush3.msra.mxu0 %v347_v5  ;;  %735 = vmatprep.subr.mxu1 %v887_v1  ;;  %v696_v14 = vld [vmem:[%s1087_s2] ss:$0 sm:$0xff]  ;;  %s809_s30 = scalar_lea.vmem %s578_s17, 128  ;;  %s813_s10 = sshll.u32 %s889_s8, 4  ;;  %s814_s10 = int_to_ptr.vmem [resolvable:$false] %s813_s10 }
  0x1b   : > { %726 = vmatprep.subr.mxu0 %v887_v1  ;;  %736 = vmatpush3.msra.mxu1 %v440_v6  ;;  %v699_v25 = vld [vmem:[%s1089_s4] ss:$0 sm:$0xff]  ;;  %p810_p12 = scmp.ne.s32.totalorder %s578_s17, %s809_s30  ;;  %s815_s27 = scalar_lea.vmem %s814_s10, 256 }
  0x1c   : > { %727 = vmatpush3.msra.mxu0 %v346_v7  ;;  %737 = vmatprep.subr.mxu1 %v887_v1  ;;  %v434_v20 = vld [vmem:[#allocation2] sm:$0xff]  ;;  %p816_p1 = scmp.lt.s32.totalorder %s578_s17, %s814_s10  ;;  %p817_p2 = scmp.lt.s32.totalorder %s815_s27, %s809_s30 }
  0x1d   : > { %729 = vmatmul.mubr.msk.f32.vlgmr.msra.gmra.mxu0 %vm343_vm1, %v345_v8  ;;  %738 = vmatpush3.msra.mxu1 %v439_v9  ;;  %v700_v38 = vld [vmem:[%s1090_s5] ss:$0 sm:$0xff]  ;;  %p811_p13 = pnand %p810_p12, %p970_p4 }
  0x1e   : > { %739 = vmatprep.subr.mxu1 %v887_v1  ;;  %747 = vmatprep.mubr.msk.f32.mxu1 %vm888_vm0, %v887_v1  ;;  %v701_v40 = vld [vmem:[%s1091_s6] ss:$0 sm:$0xff]  ;;  %p818_p3 = por %p817_p2, %p816_p1 }
  0x1f   : > { %740 = vmatpush3.msra.mxu1 %v438_v10  ;;  %p812_p0 = pneg %p811_p13 }
  0x20   : > { %741 = vmatprep.subr.mxu1 %v887_v1 }
  0x21   : > { %742 = vmatpush3.msra.mxu1 %v437_v11  ;;  %p819_p5 = pnand %p818_p3, %p812_p0 }
  0x22   : > { %743 = vmatprep.subr.mxu1 %v887_v1 }
  0x23   : > { %744 = vmatpush3.msra.mxu1 %v436_v12 }
  0x24   : > { %745 = vmatprep.subr.mxu1 %v887_v1 }
  0x25   : > { %746 = vmatpush3.msra.mxu1 %v435_v13 }
  0xdd   : > { %v427_v15 = vpop.f32.mrf.mxu0 }
  0xde   : > { %v428_v16 = vadd.f32 %v696_v14, %v427_v15 }
  0xdf   : > { %v730_v17 = vpop.f32.mrf.mxu0 }
  0xe0   : > { %vm431_vm2 = vcmp.ge.f32.partialorder %v428_v16, 0.0  ;;  %v432_v18 = vmul.f32 0.01, %v428_v16 }
  0xe2   : > { %v433_v19 = vsel %vm431_vm2, %v428_v16, %v432_v18 }
  0xe3   : > { %748 = vmatmul.mubr.msk.f32.vlgmr.msra.gmra.mxu1 %vm443_vm3, %v433_v19 }
 0x1a3   : > { %v513_v21 = vpop.f32.mrf.mxu1 }
 0x1a4   : > { %v517_v22 = vadd.f32 %v513_v21, %v434_v20 }
 0x1a5   : > { %v749_v23 = vpop.f32.mrf.mxu1 }
 0x1a6   : > { %518 = vst.msk [vmem:[#allocation2] sm:$0xff] %vm343_vm1, %v517_v22 }
 0x1ad   : > { %v522_v24 = vld [vmem:[#allocation2] sm:$0xff] }
 0x1ae   : > { %v523_v26 = vadd.f32 %v522_v24, %v345_v8 }
 0x1b0   : > { %v531_v27 = vadd.f32 %v699_v25, %v523_v26 }
 0x1b2   : > { %v532_v28 = vsel %vm343_vm1, %v531_v27, 0.0 }
 0x1b3   : > { %533 = vadd.xlane.f32.xlu0 %v532_v28 }
 0x23c   : > { %v534_v29 = vpop.xlane.xlu0 %533 }
 0x23d   : > { %v536_v30 = vmul.f32 0.03125, %v534_v29 }
 0x23f   : > { %v537_v31 = vsub.f32 %v531_v27, %v536_v30 }
 0x241   : > { %v538_v32 = vmul.f32 %v537_v31, %v537_v31 }
 0x243   : > { %v539_v33 = vsel %vm343_vm1, %v538_v32, 0.0 }
 0x244   : > { %540 = vadd.xlane.f32.xlu0 %v539_v33 }
 0x2cd   : > { %v541_v34 = vpop.xlane.xlu0 %540 }
 0x2ce   : > { %v542_v35 = vmul.f32 0.03125, %v541_v34 }
 0x2d0   : > { %v543_v36 = vadd.f32 1e-05, %v542_v35 }
 0x2d2   : > { %807 = vrsqrt.f32 %v543_v36 }
 0x2df   : > { %v808_v37 = vpop.eup %807 }
 0x2e0   : > { %v545_v39 = vmul.f32 %v808_v37, %v537_v31 }
 0x2e2   : > { %v553_v41 = vmul.f32 %v700_v38, %v545_v39 }
 0x2e4   : > { %v561_v42 = vadd.f32 %v701_v40, %v553_v41 }
 0x2e6   : > { %562 = vst.msk [vmem:[%s321_s16] sm:$0xff] %vm343_vm1, %v561_v42 }
 0x2e7   : > { %822 = shalt.err (!%p819_p5)
}
 0x2e8   : > { %s823_s23 = scalar_lea.hbm %s575_s20, 128  ;;  %s827_s15 = scalar_lea.hbm %s1092_s7, 256 }
 0x2e9   : > { %p824_p6 = scmp.ne.s32.totalorder %s575_s20, %s823_s23  ;;  %p828_p10 = scmp.lt.s32.totalorder %s575_s20, %s1092_s7 }
 0x2ea   : > { %p829_p11 = scmp.lt.s32.totalorder %s827_s15, %s823_s23 }
 0x2eb   : > { %p825_p7 = pnand %p824_p6, %p970_p4 }
 0x2ec   : > { %p830_p12 = por %p829_p11, %p828_p10 }
 0x2ed   : > { %p826_p9 = pneg %p825_p7 }
 0x2ef   : > { %p831_p13 = pnand %p830_p12, %p826_p9 }
 0x2f1   : > { %834 = shalt.err (!%p831_p13)
}
 0x2f2   : > { %750 = dma.vmem_to_hbm [thread:$0]  (%p970_p4), %s578_s17, 128, %s575_s20, %s564_s22  }
 0x2f3 PF: > { %p756_p0 = scmp.ge.s32.totalorder %s885_s29, 2  ;;  %s589_s19 = sand.u32 1, %s865_s24  }
 0x2f4   : > { %s590_s30 = scalar_lea.sflag [#allocation4], %s589_s19 }
 0x2f5   : > { %p753_p1 = pnand %p756_p0, %p977_p8 }
 0x2f7   : > { %p754_p2 = pneg %p753_p1 }
 0x2f9   : > { %860 = dma.done.wait (%p754_p2), %s590_s30, 128  }
 0x2fa   : > { %862 = vsyncadd (%p754_p2), %s590_s30, 4294967168  ;;  %s20_s29 = sadd.s32 1, %s885_s29   ;;  %s1095_s24 = smov %s869_s25 }
 0x2fb   : > { %p17_p3 = scmp.ge.s32.totalorder %s20_s29, 4   ;;  %s1096_s25 = smov %s873_s26 }
 0x2fc   : > { %s1097_s26 = smov %s983_s14  ;;  %s1098_s27 = smov %s881_s28 }
 0x2fd   : > { %s1099_s28 = smov %s1101_s9  ;;  %19 = sbr.rel (!%p17_p3) target bundleno = 4 (0x4), region = 100 }
 0x302   :  { %595 = vsyncpa [#allocation4], 1 }
 0x303   :  { %597 = vsyncpa [#allocation4 + $0x1], 1 }

</bundles_post_ra>
